<compile_context>
chip_gen: v7x
topology: tpu7x:2x2x1
jax: 0.10.0
libtpu: 0.0.40
codegen_flags: <defaults>
</compile_context>

<pallas_src>
import jax
import jax.numpy as jnp
from jax.experimental import pallas as pl
from jax.experimental.pallas import tpu as pltpu

LOG_STD_MAX = 2.0
LOG_STD_MIN = -20.0

# ------------------------------------------------------------------ config --
BATCH     = 2
IMG_SHAPE = (4, 16, 16)            # present in obs, ignored by this module
STATE_DIM = 8
GOAL_DIM  = 4
OBS_DIM   = STATE_DIM + GOAL_DIM   # 12 -> context after torch.cat(dim=1)
HIDDEN    = (32, 32)
ACT_DIM   = 4
ACT_LIMIT = 1.5

# --------------------------------------------- packed parameter slab layout --
LANES    = 128
W0_OFF   = 0          # rows   0:128, lanes 0:HIDDEN[0]   (real rows 0:OBS_DIM)
W1_OFF   = 128        # rows 128:256, lanes 0:HIDDEN[1]   (real rows 0:HIDDEN[0])
WMU_OFF  = 256        # rows 256:384, lanes 0:ACT_DIM     (real rows 0:HIDDEN[1])
WLS_OFF  = 384        # rows 384:512, lanes 0:ACT_DIM     (real rows 0:HIDDEN[1])
BIAS_OFF = 512        # row 512=b0, 513=b1, 514=b_mu, 515=b_log_std
P_ROWS   = BIAS_OFF + 8            # 520 rows (multiple of 8)


# ------------------------------------------------------------------ kernel --
def actor_kernel(ctx_ref, eps_ref, params_ref, out_ref):
    f32 = jnp.float32

    # static slices of the packed parameter slab (zero-cost views)
    w0   = params_ref[W0_OFF:W0_OFF + LANES, :]
    w1   = params_ref[W1_OFF:W1_OFF + LANES, :]
    w_mu = params_ref[WMU_OFF:WMU_OFF + LANES, :]
    w_ls = params_ref[WLS_OFF:WLS_OFF + LANES, :]
    b0   = params_ref[BIAS_OFF + 0:BIAS_OFF + 1, :]
    b1   = params_ref[BIAS_OFF + 1:BIAS_OFF + 2, :]
    b_mu = params_ref[BIAS_OFF + 2:BIAS_OFF + 3, :]
    b_ls = params_ref[BIAS_OFF + 3:BIAS_OFF + 4, :]

    # net (both layers ReLU, matching mlp(..., activation, activation))
    x = ctx_ref[...]
    h = jnp.maximum(jnp.dot(x, w0, preferred_element_type=f32) + b0, 0.0)
    h = jnp.maximum(jnp.dot(h, w1, preferred_element_type=f32) + b1, 0.0)

    # Gaussian heads
    mu      = jnp.dot(h, w_mu, preferred_element_type=f32) + b_mu
    log_std = jnp.dot(h, w_ls, preferred_element_type=f32) + b_ls
    log_std = jnp.clip(log_std, LOG_STD_MIN, LOG_STD_MAX)
    std     = jnp.exp(log_std)

    # rsample (eps == 0 -> deterministic path)
    # TODO(synk): noise could be drawn in-kernel via pltpu.prng_* + Box-Muller;
    # passing eps from the wrapper keeps exact parity with torch rsample().
    pi_action = mu + std * eps_ref[...]

    # Normal(mu, std).log_prob(pi_action)
    z    = (pi_action - mu) / std
    logp = -0.5 * z * z - log_std - 0.5 * jnp.log(2.0 * jnp.pi)

    # squash correction: 2*(log 2 - a - softplus(-2a))  (stable softplus)
    t          = -2.0 * pi_action
    softplus_t = jnp.maximum(t, 0.0) + jnp.log(1.0 + jnp.exp(-jnp.abs(t)))
    corr       = 2.0 * (jnp.log(2.0) - pi_action - softplus_t)

    # mask lane padding (lanes >= ACT_DIM) out of the reduction
    lane  = jax.lax.broadcasted_iota(jnp.int32, logp.shape, 1)
    valid = lane < ACT_DIM
    logp_pi = jnp.sum(jnp.where(valid, logp - corr, 0.0), axis=-1, keepdims=True)

    # act_limit * sigmoid(pi_action)
    act = ACT_LIMIT * (1.0 / (1.0 + jnp.exp(-pi_action)))

    # single lane-dense store: lanes [0:ACT_DIM]=action, lane ACT_DIM=logp
    out_ref[...] = jnp.where(valid, act,
                             jnp.where(lane == ACT_DIM, logp_pi, 0.0))


# ----------------------------------------------------------------- wrapper --
def _assemble_context(obs):
    """Mirror the PyTorch forward's context assembly (image is dropped)."""
    ctx = [jnp.asarray(obs[k], jnp.float32) for k in obs if k != "image"]
    if ctx[0].ndim > 1:
        return jnp.concatenate(ctx, axis=1)
    ctx = [c[None] if c.ndim == 0 else c for c in ctx]
    return jnp.concatenate(ctx, axis=0)[None]


def _round_up(x, m):
    return ((x + m - 1) // m) * m


def squashed_gaussian_actor(obs, packed_params, eps):
    """obs: dict of arrays; eps: (B, ACT_DIM) N(0,1) noise (zeros => deterministic)."""
    ctx = _assemble_context(obs)                   # (B, obs_dim)
    B, obs_dim = ctx.shape
    assert obs_dim <= LANES, "context dim must fit in one 128-lane slab"

    # batch padded to >= 8 sublanes; grid over batch tiles for larger batches
    tile_b = min(_round_up(B, 8), 128)
    b_pad  = _round_up(B, tile_b)

    ctx_pad = jnp.zeros((b_pad, LANES), jnp.float32).at[:B, :obs_dim].set(ctx)
    eps_pad = jnp.zeros((b_pad, LANES), jnp.float32).at[:B, :ACT_DIM].set(
        jnp.asarray(eps, jnp.float32))

    out = pl.pallas_call(
        actor_kernel,
        out_shape=jax.ShapeDtypeStruct((b_pad, LANES), jnp.float32),
        grid_spec=pltpu.PrefetchScalarGridSpec(
            num_scalar_prefetch=0,
            grid=(b_pad // tile_b,),
            in_specs=[
                pl.BlockSpec((tile_b, LANES), lambda b: (b, 0)),   # context
                pl.BlockSpec((tile_b, LANES), lambda b: (b, 0)),   # eps
                pl.BlockSpec((P_ROWS, LANES), lambda b: (0, 0)),   # packed params
            ],
            out_specs=pl.BlockSpec((tile_b, LANES), lambda b: (b, 0)),
        ),
        compiler_params=pltpu.CompilerParams(
            dimension_semantics=("parallel",)),
    )(ctx_pad, eps_pad, packed_params)

    pi_action = out[:B, :ACT_DIM]
    logp_pi   = out[:B, ACT_DIM]
    if pi_action.shape[0] == 1:                    # torch .squeeze(0) semantics
        pi_action = pi_action[0]
    return pi_action, logp_pi


# ------------------------------------------------------------- param init ---
def init_params(key):
    ks = jax.random.split(key, 8)
    s = 0.1
    h0, h1 = HIDDEN
    return {
        "w0":   s * jax.random.normal(ks[0], (OBS_DIM, h0), jnp.float32),
        "b0":   s * jax.random.normal(ks[1], (h0,), jnp.float32),
        "w1":   s * jax.random.normal(ks[2], (h0, h1), jnp.float32),
        "b1":   s * jax.random.normal(ks[3], (h1,), jnp.float32),
        "w_mu": s * jax.random.normal(ks[4], (h1, ACT_DIM), jnp.float32),
        "b_mu": s * jax.random.normal(ks[5], (ACT_DIM,), jnp.float32),
        "w_ls": s * jax.random.normal(ks[6], (h1, ACT_DIM), jnp.float32),
        "b_ls": s * jax.random.normal(ks[7], (ACT_DIM,), jnp.float32),
    }


def pack_params(p):
    """One-time packing of all weights/biases into a single lane-padded slab."""
    h0, h1 = HIDDEN
    assert h0 <= LANES and h1 <= LANES and ACT_DIM + 1 <= LANES
    packed = jnp.zeros((P_ROWS, LANES), jnp.float32)
    packed = packed.at[W0_OFF:W0_OFF + OBS_DIM, :h0].set(p["w0"])
    packed = packed.at[W1_OFF:W1_OFF + h0, :h1].set(p["w1"])
    packed = packed.at[WMU_OFF:WMU_OFF + h1, :ACT_DIM].set(p["w_mu"])
    packed = packed.at[WLS_OFF:WLS_OFF + h1, :ACT_DIM].set(p["w_ls"])
    packed = packed.at[BIAS_OFF + 0, :h0].set(p["b0"])
    packed = packed.at[BIAS_OFF + 1, :h1].set(p["b1"])
    packed = packed.at[BIAS_OFF + 2, :ACT_DIM].set(p["b_mu"])
    packed = packed.at[BIAS_OFF + 3, :ACT_DIM].set(p["b_ls"])
    return packed


# --------------------------------------------------------------- reference --
def reference(obs, p, eps):
    """Pure-JAX mirror of the PyTorch forward (stochastic, with_logprob=True)."""
    ctx = _assemble_context(obs)
    h = jnp.maximum(ctx @ p["w0"] + p["b0"], 0.0)
    h = jnp.maximum(h @ p["w1"] + p["b1"], 0.0)
    mu = h @ p["w_mu"] + p["b_mu"]
    log_std = jnp.clip(h @ p["w_ls"] + p["b_ls"], LOG_STD_MIN, LOG_STD_MAX)
    std = jnp.exp(log_std)
    pi_action = mu + std * eps
    z = (pi_action - mu) / std
    logp = (-0.5 * z * z - log_std - 0.5 * jnp.log(2.0 * jnp.pi)).sum(-1)
    logp -= (2.0 * (jnp.log(2.0) - pi_action
                    - jax.nn.softplus(-2.0 * pi_action))).sum(-1)
    act = ACT_LIMIT * jax.nn.sigmoid(pi_action)
    if act.shape[0] == 1:
        act = act[0]
    return act, logp


# -------------------------------------------------------------------- main --
if __name__ == "__main__":
    key = jax.random.PRNGKey(0)
    k_img, k_state, k_goal, k_par, k_eps = jax.random.split(key, 5)

    # obs dict: 'image' is present but (per the module's forward) ignored.
    obs = {
        "image": jax.random.normal(k_img, (BATCH,) + IMG_SHAPE, jnp.float32),
        "state": jax.random.normal(k_state, (BATCH, STATE_DIM), jnp.float32),
        "goal":  jax.random.normal(k_goal, (BATCH, GOAL_DIM), jnp.float32),
    }

    params = init_params(k_par)
    packed = pack_params(params)           # hoisted out of the per-call path

    # rsample noise (pass zeros for the deterministic=True path)
    eps = jax.random.normal(k_eps, (BATCH, ACT_DIM), jnp.float32)

    action, logp = squashed_gaussian_actor(obs, packed, eps)
    action, logp = jax.block_until_ready((action, logp))

    ref_action, ref_logp = reference(obs, params, eps)
    assert action.shape == (BATCH, ACT_DIM), action.shape
    assert logp.shape == (BATCH,), logp.shape
    assert jnp.allclose(action, ref_action, atol=1e-4, rtol=1e-4), (action, ref_action)
    assert jnp.allclose(logp, ref_logp, atol=1e-4, rtol=1e-4), (logp, ref_logp)

    print("KERNEL_OK")
</pallas_src>

<mosaic_0001>
module attributes {stable_mosaic.version = 11 : i64} {
  func.func @actor_kernel(%arg0: i32, %arg1: memref<8x128xf32, #tpu.memory_space<vmem>>, %arg2: memref<8x128xf32, #tpu.memory_space<vmem>>, %arg3: memref<520x128xf32, #tpu.memory_space<vmem>>, %arg4: memref<8x128xf32, #tpu.memory_space<vmem>>) attributes {dimension_semantics = [#tpu.dimension_semantics<parallel>], iteration_bounds = array<i64: 1>, scalar_prefetch = 0 : i64, scratch_operands = 0 : i64, tpu.core_type = #tpu.core_type<tc>, window_params = [{transform_indices = @transform_0, window_bounds = array<i64: 8, 128>}, {transform_indices = @transform_1, window_bounds = array<i64: 8, 128>}, {pipeline_mode = #tpu.pipeline_mode<synchronous>, transform_indices = @transform_2, window_bounds = array<i64: 520, 128>}, {transform_indices = @transform_3, window_bounds = array<i64: 8, 128>}]} {
    %c0 = arith.constant 0 : index
    %c0_0 = arith.constant 0 : index
    %0 = vector.load %arg3[%c0, %c0_0] : memref<520x128xf32, #tpu.memory_space<vmem>>, vector<128x128xf32>
    %c128 = arith.constant 128 : index
    %c0_1 = arith.constant 0 : index
    %1 = vector.load %arg3[%c128, %c0_1] : memref<520x128xf32, #tpu.memory_space<vmem>>, vector<128x128xf32>
    %c256 = arith.constant 256 : index
    %c0_2 = arith.constant 0 : index
    %2 = vector.load %arg3[%c256, %c0_2] : memref<520x128xf32, #tpu.memory_space<vmem>>, vector<128x128xf32>
    %c384 = arith.constant 384 : index
    %c0_3 = arith.constant 0 : index
    %3 = vector.load %arg3[%c384, %c0_3] : memref<520x128xf32, #tpu.memory_space<vmem>>, vector<128x128xf32>
    %c512 = arith.constant 512 : index
    %c0_4 = arith.constant 0 : index
    %4 = vector.load %arg3[%c512, %c0_4] : memref<520x128xf32, #tpu.memory_space<vmem>>, vector<1x128xf32>
    %c513 = arith.constant 513 : index
    %c0_5 = arith.constant 0 : index
    %5 = vector.load %arg3[%c513, %c0_5] : memref<520x128xf32, #tpu.memory_space<vmem>>, vector<1x128xf32>
    %c514 = arith.constant 514 : index
    %c0_6 = arith.constant 0 : index
    %6 = vector.load %arg3[%c514, %c0_6] : memref<520x128xf32, #tpu.memory_space<vmem>>, vector<1x128xf32>
    %c515 = arith.constant 515 : index
    %c0_7 = arith.constant 0 : index
    %7 = vector.load %arg3[%c515, %c0_7] : memref<520x128xf32, #tpu.memory_space<vmem>>, vector<1x128xf32>
    %c0_8 = arith.constant 0 : index
    %c0_9 = arith.constant 0 : index
    %8 = vector.load %arg1[%c0_8, %c0_9] : memref<8x128xf32, #tpu.memory_space<vmem>>, vector<8x128xf32>
    %cst = arith.constant dense<0.000000e+00> : vector<8x128xf32>
    %9 = tpu.matmul %8, %0, %cst {dimension_numbers = #tpu.dot_dimension_numbers<[1], [0], [0], [1], [0, 0, 1, 1], [], []>} : vector<8x128xf32>, vector<128x128xf32>, vector<8x128xf32> -> vector<8x128xf32>
    %10 = vector.broadcast %4 : vector<1x128xf32> to vector<8x128xf32>
    %11 = arith.addf %9, %10 : vector<8x128xf32>
    %cst_10 = arith.constant 0.000000e+00 : f32
    %12 = vector.broadcast %cst_10 : f32 to vector<8x128xf32>
    %13 = arith.maximumf %11, %12 : vector<8x128xf32>
    %cst_11 = arith.constant dense<0.000000e+00> : vector<8x128xf32>
    %14 = tpu.matmul %13, %1, %cst_11 {dimension_numbers = #tpu.dot_dimension_numbers<[1], [0], [0], [1], [0, 0, 1, 1], [], []>} : vector<8x128xf32>, vector<128x128xf32>, vector<8x128xf32> -> vector<8x128xf32>
    %15 = vector.broadcast %5 : vector<1x128xf32> to vector<8x128xf32>
    %16 = arith.addf %14, %15 : vector<8x128xf32>
    %cst_12 = arith.constant 0.000000e+00 : f32
    %17 = vector.broadcast %cst_12 : f32 to vector<8x128xf32>
    %18 = arith.maximumf %16, %17 : vector<8x128xf32>
    %cst_13 = arith.constant dense<0.000000e+00> : vector<8x128xf32>
    %19 = tpu.matmul %18, %2, %cst_13 {dimension_numbers = #tpu.dot_dimension_numbers<[1], [0], [0], [1], [0, 0, 1, 1], [], []>} : vector<8x128xf32>, vector<128x128xf32>, vector<8x128xf32> -> vector<8x128xf32>
    %20 = vector.broadcast %6 : vector<1x128xf32> to vector<8x128xf32>
    %21 = arith.addf %19, %20 : vector<8x128xf32>
    %cst_14 = arith.constant dense<0.000000e+00> : vector<8x128xf32>
    %22 = tpu.matmul %18, %3, %cst_14 {dimension_numbers = #tpu.dot_dimension_numbers<[1], [0], [0], [1], [0, 0, 1, 1], [], []>} : vector<8x128xf32>, vector<128x128xf32>, vector<8x128xf32> -> vector<8x128xf32>
    %23 = vector.broadcast %7 : vector<1x128xf32> to vector<8x128xf32>
    %24 = arith.addf %22, %23 : vector<8x128xf32>
    %cst_15 = arith.constant -2.000000e+01 : f32
    %cst_16 = arith.constant 2.000000e+00 : f32
    %25 = vector.broadcast %cst_15 : f32 to vector<8x128xf32>
    %26 = arith.maximumf %25, %24 : vector<8x128xf32>
    %27 = vector.broadcast %cst_16 : f32 to vector<8x128xf32>
    %28 = arith.minimumf %27, %26 : vector<8x128xf32>
    %29 = math.exp %28 : vector<8x128xf32>
    %c0_17 = arith.constant 0 : index
    %c0_18 = arith.constant 0 : index
    %30 = vector.load %arg2[%c0_17, %c0_18] : memref<8x128xf32, #tpu.memory_space<vmem>>, vector<8x128xf32>
    %31 = arith.mulf %29, %30 : vector<8x128xf32>
    %32 = arith.addf %21, %31 : vector<8x128xf32>
    %33 = arith.subf %32, %21 : vector<8x128xf32>
    %34 = arith.divf %33, %29 : vector<8x128xf32>
    %cst_19 = arith.constant -5.000000e-01 : f32
    %35 = vector.broadcast %cst_19 : f32 to vector<8x128xf32>
    %36 = arith.mulf %35, %34 : vector<8x128xf32>
    %37 = arith.mulf %36, %34 : vector<8x128xf32>
    %38 = arith.subf %37, %28 : vector<8x128xf32>
    %cst_20 = arith.constant 6.28318548 : f32
    %39 = math.log %cst_20 : f32
    %cst_21 = arith.constant 5.000000e-01 : f32
    %40 = arith.mulf %cst_21, %39 : f32
    %41 = vector.broadcast %40 : f32 to vector<8x128xf32>
    %42 = arith.subf %38, %41 : vector<8x128xf32>
    %cst_22 = arith.constant -2.000000e+00 : f32
    %43 = vector.broadcast %cst_22 : f32 to vector<8x128xf32>
    %44 = arith.mulf %43, %32 : vector<8x128xf32>
    %cst_23 = arith.constant 0.000000e+00 : f32
    %45 = vector.broadcast %cst_23 : f32 to vector<8x128xf32>
    %46 = arith.maximumf %44, %45 : vector<8x128xf32>
    %47 = math.absf %44 : vector<8x128xf32>
    %cst_24 = arith.constant 0.000000e+00 : f32
    %48 = vector.broadcast %cst_24 : f32 to vector<8x128xf32>
    %49 = arith.subf %48, %47 : vector<8x128xf32>
    %50 = math.exp %49 : vector<8x128xf32>
    %cst_25 = arith.constant 1.000000e+00 : f32
    %51 = vector.broadcast %cst_25 : f32 to vector<8x128xf32>
    %52 = arith.addf %51, %50 : vector<8x128xf32>
    %53 = math.log %52 : vector<8x128xf32>
    %54 = arith.addf %46, %53 : vector<8x128xf32>
    %cst_26 = arith.constant 2.000000e+00 : f32
    %55 = math.log %cst_26 : f32
    %56 = vector.broadcast %55 : f32 to vector<8x128xf32>
    %57 = arith.subf %56, %32 : vector<8x128xf32>
    %58 = arith.subf %57, %54 : vector<8x128xf32>
    %cst_27 = arith.constant 2.000000e+00 : f32
    %59 = vector.broadcast %cst_27 : f32 to vector<8x128xf32>
    %60 = arith.mulf %59, %58 : vector<8x128xf32>
    %61 = tpu.iota {dimensions = array<i32: 1>} : vector<8x128xi32>
    %c4_i32 = arith.constant 4 : i32
    %62 = vector.broadcast %c4_i32 : i32 to vector<8x128xi32>
    %63 = arith.cmpi slt, %61, %62 : vector<8x128xi32>
    %64 = arith.subf %42, %60 : vector<8x128xf32>
    %cst_28 = arith.constant 0.000000e+00 : f32
    %65 = vector.broadcast %cst_28 : f32 to vector<8x128xf32>
    %66 = arith.select %63, %64, %65 : vector<8x128xi1>, vector<8x128xf32>
    %cst_29 = arith.constant dense<0.000000e+00> : vector<8xf32>
    %67 = vector.multi_reduction <add>, %66, %cst_29 [1] : vector<8x128xf32> to vector<8xf32>
    %68 = vector.shape_cast %67 : vector<8xf32> to vector<8x1xf32>
    %cst_30 = arith.constant 0.000000e+00 : f32
    %69 = vector.broadcast %cst_30 : f32 to vector<8x128xf32>
    %70 = arith.subf %69, %32 : vector<8x128xf32>
    %71 = math.exp %70 : vector<8x128xf32>
    %cst_31 = arith.constant 1.000000e+00 : f32
    %72 = vector.broadcast %cst_31 : f32 to vector<8x128xf32>
    %73 = arith.addf %72, %71 : vector<8x128xf32>
    %cst_32 = arith.constant 1.000000e+00 : f32
    %74 = vector.broadcast %cst_32 : f32 to vector<8x128xf32>
    %75 = arith.divf %74, %73 : vector<8x128xf32>
    %cst_33 = arith.constant 1.500000e+00 : f32
    %76 = vector.broadcast %cst_33 : f32 to vector<8x128xf32>
    %77 = arith.mulf %76, %75 : vector<8x128xf32>
    %c4_i32_34 = arith.constant 4 : i32
    %78 = vector.broadcast %c4_i32_34 : i32 to vector<8x128xi32>
    %79 = arith.cmpi eq, %61, %78 : vector<8x128xi32>
    %cst_35 = arith.constant 0.000000e+00 : f32
    %80 = vector.shape_cast %68 : vector<8x1xf32> to vector<8x1xf32>
    %81 = vector.broadcast %80 : vector<8x1xf32> to vector<8x128xf32>
    %82 = vector.broadcast %cst_35 : f32 to vector<8x128xf32>
    %83 = arith.select %79, %81, %82 : vector<8x128xi1>, vector<8x128xf32>
    %84 = arith.select %63, %77, %83 : vector<8x128xi1>, vector<8x128xf32>
    %c0_36 = arith.constant 0 : index
    %c0_37 = arith.constant 0 : index
    %85 = vector.load %arg4[%c0_36, %c0_37] : memref<8x128xf32, #tpu.memory_space<vmem>>, vector<8x128xf32>
    tpu.vector_store %arg4[%c0_36, %c0_37], %84 {strides = array<i32>} : memref<8x128xf32, #tpu.memory_space<vmem>>, vector<8x128xf32>,
    return
  }
  func.func @transform_0(%arg0: i32) -> (i32, i32) {
    %c0_i32 = arith.constant 0 : i32
    %c0_i32_0 = arith.constant 0 : i32
    return %arg0, %c0_i32 : i32, i32
  }
  func.func @transform_1(%arg0: i32) -> (i32, i32) {
    %c0_i32 = arith.constant 0 : i32
    %c0_i32_0 = arith.constant 0 : i32
    return %arg0, %c0_i32 : i32, i32
  }
  func.func @transform_2(%arg0: i32) -> (i32, i32) {
    %c0_i32 = arith.constant 0 : i32
    %c0_i32_0 = arith.constant 0 : i32
    %c0_i32_1 = arith.constant 0 : i32
    return %c0_i32, %c0_i32_0 : i32, i32
  }
  func.func @transform_3(%arg0: i32) -> (i32, i32) {
    %c0_i32 = arith.constant 0 : i32
    %c0_i32_0 = arith.constant 0 : i32
    return %arg0, %c0_i32 : i32, i32
  }
}

</mosaic_0001>

<bundles_post_ra>
// kernel: tpu_custom_call.1
= control target key start
LH: loop header
LB: loop body
LE: loop exit
PB: predicated region body
PF: predicated region fallthrough
CT: control target
= control target key end

     0   :  { %8 = vsyncpa [#allocation3], 0  ;;  %s1023_s0 = inlined_call_operand.hbm [shape: f32[8,128], index: 0, kind: input, shape index: {}]   ;;  %s1024_s1 = inlined_call_operand.hbm [shape: f32[8,128], index: 1, kind: input, shape index: {}]   ;;  %s1025_s2 = inlined_call_operand.hbm [shape: f32[520,128], index: 2, kind: input, shape index: {}]   ;;  %s1026_s3 = inlined_call_operand.hbm [shape: f32[8,128], index: 3, kind: output, shape index: {}]  }
   0x1   :  { %9 = vsyncpa [#allocation6], 0 }
   0x2   :  { %10 = vsyncpa [#allocation4], 0  ;;  %s904_s12 = smov [#allocation5]   ;;  %s905_s14 = smov [#allocation2]  }
   0x3   :  { %s27_s13 = sshll.u32 %s904_s12, 4  ;;  %s17_s15 = sshll.u32 %s905_s14, 4  ;;  %s28_s13 = int_to_ptr.vmem [resolvable:$true] %s27_s13  ;;  %s18_s15 = int_to_ptr.vmem [resolvable:$true] %s17_s15 }
   0x4   :  { %s810_s18 = scalar_lea.hbm %s1024_s1, 128 }
   0x5   :  { %p811_p0 = scmp.ne.s32.totalorder %s1024_s1, %s810_s18  ;;  %p814_p1 = scmp.lt.u32.totalorder %s810_s18, %s1024_s1 }
   0x7   :  { %p816_p2 = pnand %p814_p1, %p811_p0 }
   0x9   :  { %819 = shalt.err (!%p816_p2)
}
   0xa   :  { %s820_s23 = scalar_lea.vmem %s28_s13, 128  ;;  %p825_p4 = scmp.lt.s32.totalorder %s28_s13, %s28_s13 }
   0xb   :  { %p821_p3 = scmp.ne.s32.totalorder %s28_s13, %s820_s23  ;;  %p826_p5 = scmp.lt.s32.totalorder %s820_s23, %s820_s23 }
   0xd   :  { %p827_p6 = por %p826_p5, %p825_p4 }
   0xf   :  { %p828_p7 = pnand %p827_p6, %p821_p3 }
  0x11   :  { %831 = shalt.err (!%p828_p7)
}
  0x12   :  { %30 = dma.hbm_to_vmem [thread:$0]  %s1024_s1, 128, %s28_s13, [#allocation6]  }
  0x13   :  { %s832_s28 = scalar_lea.hbm %s1023_s0, 128 }
  0x14   :  { %p833_p8 = scmp.ne.s32.totalorder %s1023_s0, %s832_s28  ;;  %p836_p9 = scmp.lt.u32.totalorder %s832_s28, %s1023_s0 }
  0x16   :  { %p838_p10 = pnand %p836_p9, %p833_p8 }
  0x18   :  { %841 = shalt.err (!%p838_p10)
}
  0x19   :  { %s842_s6 = scalar_lea.vmem %s18_s15, 128  ;;  %p847_p12 = scmp.lt.s32.totalorder %s18_s15, %s18_s15 }
  0x1a   :  { %p843_p11 = scmp.ne.s32.totalorder %s18_s15, %s842_s6  ;;  %p848_p13 = scmp.lt.s32.totalorder %s842_s6, %s842_s6 }
  0x1c   :  { %p849_p0 = por %p848_p13, %p847_p12 }
  0x1e   :  { %p850_p1 = pnand %p849_p0, %p843_p11 }
  0x20   :  { %853 = shalt.err (!%p850_p1)
}
  0x21   :  { %20 = dma.hbm_to_vmem [thread:$0]  %s1023_s0, 128, %s18_s15, [#allocation3]  }
  0x22   :  { %s906_s8 = smov [#allocation7]   ;;  %s854_s12 = scalar_lea.hbm %s1025_s2, 8320 }
  0x23   :  { %s36_s9 = sshll.u32 %s906_s8, 4  ;;  %p855_p2 = scmp.ne.s32.totalorder %s1025_s2, %s854_s12  ;;  %s37_s9 = int_to_ptr.vmem [resolvable:$true] %s36_s9 }
  0x24   :  { %p858_p3 = scmp.lt.u32.totalorder %s854_s12, %s1025_s2 }
  0x26   :  { %p860_p4 = pnand %p858_p3, %p855_p2 }
  0x28   :  { %863 = shalt.err (!%p860_p4)
}
  0x29   :  { %s864_s18 = scalar_lea.vmem %s37_s9, 8320  ;;  %p869_p6 = scmp.lt.s32.totalorder %s37_s9, %s37_s9 }
  0x2a   :  { %p865_p5 = scmp.ne.s32.totalorder %s37_s9, %s864_s18  ;;  %p870_p7 = scmp.lt.s32.totalorder %s864_s18, %s864_s18 }
  0x2c   :  { %p871_p8 = por %p870_p7, %p869_p6 }
  0x2e   :  { %p872_p9 = pnand %p871_p8, %p865_p5 }
  0x30   :  { %875 = shalt.err (!%p872_p9)
}
  0x31   :  { %s907_s0 = smov 128   ;;  %s908_s15 = smov 8  }
  0x32   :  { %42 = dma.hbm_to_vmem [thread:$0]  %s1025_s2, 8320, %s37_s9, [#allocation6], %s907_s0, %s907_s0, %s908_s15  }
  0x33   :  { %898 = dma.done.wait [#allocation3], 128  }
  0x34   :  { %899 = vsyncadd [#allocation3], 4294967168 }
  0x35   :  { %900 = dma.done.wait [#allocation6], 8448  }
  0x36   :  { %901 = vsyncadd [#allocation6], 4294958848  ;;  %v909_v0 = vmov 0.0|0.0   ;;  %vm910_vm0 = vmmov 0   ;;  %v911_v1 = vmov 0.0   ;;  %v52_v2 = vld [vmem:[#allocation7] sm:$0xff] }
  0x37   :  { %693 = vmatprep.subr.bf16.mxu0 %v909_v0  ;;  %585 = vmatprep.mubr.msk.f32.mxu0 %vm910_vm0, %v911_v1  ;;  %v53_v3 = vld [vmem:[#allocation7 + $0x8] sm:$0xff]  ;;  %v54_v4 = vld [vmem:[#allocation7 + $0x10] sm:$0xff]  ;;  %v55_v6 = vld [vmem:[#allocation7 + $0x18] sm:$0xff]  ;;  %s912_s2 = smov [#allocation8]  }
  0x38   :  { %717 = vmatprep.subr.bf16.mxu1 %v909_v0  ;;  %620 = vmatprep.mubr.msk.f32.mxu1 %vm910_vm0, %v911_v1  ;;  %v694_v5 = vpack.c.bf16 %v53_v3, %v52_v2  ;;  %v697_v7 = vpack.c.bf16 %v55_v6, %v54_v4  ;;  %v56_v8 = vld [vmem:[#allocation7 + $0x20] sm:$0xff]  ;;  %v57_v9 = vld [vmem:[#allocation7 + $0x28] sm:$0xff]  ;;  %v70_v12 = vld [vmem:[#allocation7 + $0x90] sm:$0xff]  ;;  %s470_s21 = sshll.u32 %s912_s2, 4  ;;  %s471_s21 = int_to_ptr.vmem [resolvable:$true] %s470_s21 }
  0x39   :  { %v68_v10 = vld [vmem:[#allocation7 + $0x80] sm:$0xff]  ;;  %v69_v11 = vld [vmem:[#allocation7 + $0x88] sm:$0xff]  ;;  %v71_v13 = vld [vmem:[#allocation7 + $0x98] sm:$0xff]  ;;  %v700_v14 = vpack.c.bf16 %v57_v9, %v56_v8  ;;  %s876_s22 = scalar_lea.vmem %s471_s21, 128  ;;  %p881_p11 = scmp.lt.s32.totalorder %s471_s21, %s471_s21 }
  0x3a   :  { %695 = vmatpush3.bf16.msra.mxu0 %v694_v5  ;;  %v718_v15 = vpack.c.bf16 %v69_v11, %v68_v10  ;;  %v58_v16 = vld [vmem:[#allocation7 + $0x30] sm:$0xff]  ;;  %v59_v17 = vld [vmem:[#allocation7 + $0x38] sm:$0xff]  ;;  %v721_v18 = vpack.c.bf16 %v71_v13, %v70_v12  ;;  %v72_v19 = vld [vmem:[#allocation7 + $0xa0] sm:$0xff]  ;;  %p877_p10 = scmp.ne.s32.totalorder %s471_s21, %s876_s22  ;;  %p882_p12 = scmp.lt.s32.totalorder %s876_s22, %s876_s22 }
  0x3b   :  { %696 = vmatprep.subr.bf16.mxu0 %v909_v0  ;;  %v73_v20 = vld [vmem:[#allocation7 + $0xa8] sm:$0xff]  ;;  %v703_v21 = vpack.c.bf16 %v59_v17, %v58_v16  ;;  %v60_v22 = vld [vmem:[#allocation7 + $0x40] sm:$0xff]  ;;  %v74_v25 = vld [vmem:[#allocation7 + $0xb0] sm:$0xff] }
  0x3c   :  { %719 = vmatpush3.bf16.msra.mxu1 %v718_v15  ;;  %v61_v23 = vld [vmem:[#allocation7 + $0x48] sm:$0xff]  ;;  %v724_v24 = vpack.c.bf16 %v73_v20, %v72_v19  ;;  %v75_v26 = vld [vmem:[#allocation7 + $0xb8] sm:$0xff]  ;;  %v62_v28 = vld [vmem:[#allocation7 + $0x50] sm:$0xff]  ;;  %p883_p13 = por %p882_p12, %p881_p11 }
  0x3d   :  { %720 = vmatprep.subr.bf16.mxu1 %v909_v0  ;;  %v706_v27 = vpack.c.bf16 %v61_v23, %v60_v22  ;;  %v63_v29 = vld [vmem:[#allocation7 + $0x58] sm:$0xff]  ;;  %v727_v30 = vpack.c.bf16 %v75_v26, %v74_v25  ;;  %v76_v31 = vld [vmem:[#allocation7 + $0xc0] sm:$0xff]  ;;  %v77_v32 = vld [vmem:[#allocation7 + $0xc8] sm:$0xff] }
  0x3e   :  { %698 = vmatpush3.bf16.msra.mxu0 %v697_v7  ;;  %v709_v33 = vpack.c.bf16 %v63_v29, %v62_v28  ;;  %v64_v34 = vld [vmem:[#allocation7 + $0x60] sm:$0xff]  ;;  %v65_v35 = vld [vmem:[#allocation7 + $0x68] sm:$0xff]  ;;  %v730_v36 = vpack.c.bf16 %v77_v32, %v76_v31  ;;  %v78_v37 = vld [vmem:[#allocation7 + $0xd0] sm:$0xff]  ;;  %p884_p0 = pnand %p883_p13, %p877_p10 }
  0x3f   :  { %699 = vmatprep.subr.bf16.mxu0 %v909_v0  ;;  %v79_v38 = vld [vmem:[#allocation7 + $0xd8] sm:$0xff]  ;;  %v712_v39 = vpack.c.bf16 %v65_v35, %v64_v34  ;;  %v66_v40 = vld [vmem:[#allocation7 + $0x70] sm:$0xff]  ;;  %v80_v43 = vld [vmem:[#allocation7 + $0xe0] sm:$0xff] }
  0x40   :  { %722 = vmatpush3.bf16.msra.mxu1 %v721_v18  ;;  %v67_v41 = vld [vmem:[#allocation7 + $0x78] sm:$0xff]  ;;  %v733_v42 = vpack.c.bf16 %v79_v38, %v78_v37  ;;  %v81_v44 = vld [vmem:[#allocation7 + $0xe8] sm:$0xff]  ;;  %v120_v47 = vld [vmem:[#allocation2] sm:$0xff] }
  0x41   :  { %723 = vmatprep.subr.bf16.mxu1 %v909_v0  ;;  %v715_v45 = vpack.c.bf16 %v67_v41, %v66_v40  ;;  %v736_v46 = vpack.c.bf16 %v81_v44, %v80_v43  ;;  %v82_v48 = vld [vmem:[#allocation7 + $0xf0] sm:$0xff]  ;;  %v83_v49 = vld [vmem:[#allocation7 + $0xf8] sm:$0xff]  ;;  %v84_v51 = vld [vmem:[#allocation7 + $0x100] sm:$0xff] }
  0x42   :  { %701 = vmatpush3.bf16.msra.mxu0 %v700_v14  ;;  %v739_v50 = vpack.c.bf16 %v83_v49, %v82_v48  ;;  %v85_v52 = vld [vmem:[#allocation7 + $0x108] sm:$0xff]  ;;  %v86_v54 = vld [vmem:[#allocation7 + $0x110] sm:$0xff]  ;;  %v87_v55 = vld [vmem:[#allocation7 + $0x118] sm:$0xff] }
  0x43   :  { %702 = vmatprep.subr.bf16.mxu0 %v909_v0  ;;  %v742_v53 = vpack.c.bf16 %v85_v52, %v84_v51  ;;  %v745_v56 = vpack.c.bf16 %v87_v55, %v86_v54  ;;  %v88_v57 = vld [vmem:[#allocation7 + $0x120] sm:$0xff]  ;;  %v89_v58 = vld [vmem:[#allocation7 + $0x128] sm:$0xff]  ;;  %v90_v60 = vld [vmem:[#allocation7 + $0x130] sm:$0xff] }
  0x44   :  { %725 = vmatpush3.bf16.msra.mxu1 %v724_v24  ;;  %v748_v59 = vpack.c.bf16 %v89_v58, %v88_v57  ;;  %v91_v61 = vld [vmem:[#allocation7 + $0x138] sm:$0xff]  ;;  %v92_v63 = vld [vmem:[#allocation7 + $0x140] sm:$0xff]  ;;  %v93_v2 = vld [vmem:[#allocation7 + $0x148] sm:$0xff] }
  0x45   :  { %726 = vmatprep.subr.bf16.mxu1 %v909_v0  ;;  %v751_v62 = vpack.c.bf16 %v91_v61, %v90_v60  ;;  %v754_v3 = vpack.c.bf16 %v93_v2, %v92_v63  ;;  %v94_v4 = vld [vmem:[#allocation7 + $0x150] sm:$0xff]  ;;  %v95_v5 = vld [vmem:[#allocation7 + $0x158] sm:$0xff]  ;;  %v96_v7 = vld [vmem:[#allocation7 + $0x160] sm:$0xff] }
  0x46   :  { %704 = vmatpush3.bf16.msra.mxu0 %v703_v21  ;;  %v757_v6 = vpack.c.bf16 %v95_v5, %v94_v4  ;;  %v97_v8 = vld [vmem:[#allocation7 + $0x168] sm:$0xff]  ;;  %v480_v10 = vld [vmem:[#allocation7 + $0x200] ss:$0 sm:$0xff]  ;;  %v102_v18 = vld [vmem:[#allocation7 + $0x190] sm:$0xff] }
  0x47   :  { %705 = vmatprep.subr.bf16.mxu0 %v909_v0  ;;  %v760_v9 = vpack.c.bf16 %v97_v8, %v96_v7  ;;  %v100_v11 = vld [vmem:[#allocation7 + $0x180] sm:$0xff]  ;;  %v101_v12 = vld [vmem:[#allocation7 + $0x188] sm:$0xff]  ;;  %v103_v19 = vld [vmem:[#allocation7 + $0x198] sm:$0xff] }
  0x48   :  { %728 = vmatpush3.bf16.msra.mxu1 %v727_v30  ;;  %v766_v16 = vpack.c.bf16 %v101_v12, %v100_v11  ;;  %v769_v20 = vpack.c.bf16 %v103_v19, %v102_v18  ;;  %v104_v21 = vld [vmem:[#allocation7 + $0x1a0] sm:$0xff]  ;;  %v105_v22 = vld [vmem:[#allocation7 + $0x1a8] sm:$0xff]  ;;  %v106_v24 = vld [vmem:[#allocation7 + $0x1b0] sm:$0xff]  ;;  %v446_v11 = vlaneseq }
  0x49   :  { %729 = vmatprep.subr.bf16.mxu1 %v909_v0  ;;  %v772_v23 = vpack.c.bf16 %v105_v22, %v104_v21  ;;  %v107_v25 = vld [vmem:[#allocation7 + $0x1b8] sm:$0xff]  ;;  %v109_v28 = vld [vmem:[#allocation7 + $0x1c8] sm:$0xff]  ;;  %v112_v32 = vld [vmem:[#allocation7 + $0x1e0] sm:$0xff] }
  0x4a   :  { %707 = vmatpush3.bf16.msra.mxu0 %v706_v27  ;;  %v775_v26 = vpack.c.bf16 %v107_v25, %v106_v24  ;;  %v108_v27 = vld [vmem:[#allocation7 + $0x1c0] sm:$0xff]  ;;  %v111_v30 = vld [vmem:[#allocation7 + $0x1d8] sm:$0xff]  ;;  %v98_v35 = vld [vmem:[#allocation7 + $0x170] sm:$0xff] }
  0x4b   :  { %708 = vmatprep.subr.bf16.mxu0 %v909_v0  ;;  %v778_v29 = vpack.c.bf16 %v109_v28, %v108_v27  ;;  %v114_v37 = vld [vmem:[#allocation7 + $0x1f0] sm:$0xff]  ;;  %v481_v41 = vld [vmem:[#allocation7 + $0x201] ss:$0 sm:$0xff]  ;;  %v482_v54 = vld [vmem:[#allocation7 + $0x202] ss:$0 sm:$0xff] }
  0x4c   :  { %731 = vmatpush3.bf16.msra.mxu1 %v730_v36  ;;  %v99_v36 = vld [vmem:[#allocation7 + $0x178] sm:$0xff] }
  0x4d   :  { %732 = vmatprep.subr.bf16.mxu1 %v909_v0  ;;  %v763_v38 = vpack.c.bf16 %v99_v36, %v98_v35  ;;  %v423_v55 = vld [vmem:[#allocation5] sm:$0xff] }
  0x4e   :  { %710 = vmatpush3.bf16.msra.mxu0 %v709_v33  ;;  %v113_v33 = vld [vmem:[#allocation7 + $0x1e8] sm:$0xff] }
  0x4f   :  { %711 = vmatprep.subr.bf16.mxu0 %v909_v0  ;;  %v784_v34 = vpack.c.bf16 %v113_v33, %v112_v32 }
  0x50   :  { %734 = vmatpush3.bf16.msra.mxu1 %v733_v42 }
  0x51   :  { %735 = vmatprep.subr.bf16.mxu1 %v909_v0 }
  0x52   :  { %713 = vmatpush3.bf16.msra.mxu0 %v712_v39  ;;  %v115_v39 = vld [vmem:[#allocation7 + $0x1f8] sm:$0xff] }
  0x53   :  { %714 = vmatprep.subr.bf16.mxu0 %v909_v0  ;;  %v787_v40 = vpack.c.bf16 %v115_v39, %v114_v37 }
  0x54   :  { %737 = vmatpush3.bf16.msra.mxu1 %v736_v46  ;;  %v483_v46 = vld [vmem:[#allocation7 + $0x203] ss:$0 sm:$0xff] }
  0x55   :  { %738 = vmatprep.subr.bf16.mxu1 %v909_v0 }
  0x56   :  { %716 = vmatpush3.bf16.msra.mxu0 %v715_v45 }
  0x57   :  { %741 = vmatprep.subr.bf16.mxu0 %v909_v0 }
  0x58   :  { %740 = vmatpush3.bf16.msra.mxu1 %v739_v50 }
  0x59   :  { %586 = vmatmul.mubr.f32.vlgmr.msra.gmra.mrb[0].mxu0 %v120_v47  ;;  %765 = vmatprep.subr.bf16.mxu1 %v909_v0 }
  0x5a   :  { %655 = vmatprep.mubr.msk.f32.mxu0 %vm910_vm0, %v911_v1  ;;  %743 = vmatpush3.bf16.msra.mxu0 %v742_v53 }
  0x5b   :  { %744 = vmatprep.subr.bf16.mxu0 %v909_v0 }
  0x5e   :  { %746 = vmatpush3.bf16.msra.mxu0 %v745_v56 }
  0x5f   :  { %747 = vmatprep.subr.bf16.mxu0 %v909_v0 }
  0x62   :  { %749 = vmatpush3.bf16.msra.mxu0 %v748_v59 }
  0x63   :  { %750 = vmatprep.subr.bf16.mxu0 %v909_v0 }
  0x66   :  { %752 = vmatpush3.bf16.msra.mxu0 %v751_v62 }
  0x67   :  { %753 = vmatprep.subr.bf16.mxu0 %v909_v0 }
  0x6a   :  { %755 = vmatpush3.bf16.msra.mxu0 %v754_v3 }
  0x6b   :  { %756 = vmatprep.subr.bf16.mxu0 %v909_v0 }
  0x6e   :  { %758 = vmatpush3.bf16.msra.mxu0 %v757_v6 }
  0x6f   :  { %759 = vmatprep.subr.bf16.mxu0 %v909_v0 }
  0x72   :  { %761 = vmatpush3.bf16.msra.mxu0 %v760_v9 }
  0x73   :  { %762 = vmatprep.subr.bf16.mxu0 %v909_v0 }
  0x76   :  { %764 = vmatpush3.bf16.msra.mxu0 %v763_v38 }
 0x12c   :  { %v191_v13 = vpop.f32.mrb[0].mxu0 }
 0x12d   :  { %v192_v14 = vadd.f32 %v480_v10, %v191_v13  ;;  %v587_v15 = vpop.f32.mrb[1].mxu0 }
 0x12f   :  { %v195_v17 = vmax.f32 %v192_v14, 0.0 }
 0x131   :  { %621 = vmatmul.mubr.f32.vlgmr.msra.gmra.mrb[0].mxu1 %v195_v17 }
 0x132   :  { %767 = vmatpush3.bf16.msra.mxu1 %v766_v16  ;;  %690 = vmatprep.mubr.msk.f32.mxu1 %vm910_vm0, %v911_v1  ;;  %v110_v1 = vld [vmem:[#allocation7 + $0x1d0] sm:$0xff]  ;;  %v447_v16 = vand.u32 127, %v446_v11 }
 0x133   :  { %768 = vmatprep.subr.bf16.mxu1 %v909_v0  ;;  %v781_v31 = vpack.c.bf16 %v111_v30, %v110_v1 }
 0x134   :  { %vm448_vm1 = vcmp.lt.s32.totalorder %v447_v16, 4  ;;  %vm460_vm2 = vcmp.eq.s32.totalorder %v447_v16, 4 }
 0x136   :  { %770 = vmatpush3.bf16.msra.mxu1 %v769_v20 }
 0x137   :  { %771 = vmatprep.subr.bf16.mxu1 %v909_v0 }
 0x13a   :  { %773 = vmatpush3.bf16.msra.mxu1 %v772_v23 }
 0x13b   :  { %774 = vmatprep.subr.bf16.mxu1 %v909_v0 }
 0x13e   :  { %776 = vmatpush3.bf16.msra.mxu1 %v775_v26 }
 0x13f   :  { %777 = vmatprep.subr.bf16.mxu1 %v909_v0 }
 0x142   :  { %779 = vmatpush3.bf16.msra.mxu1 %v778_v29 }
 0x143   :  { %780 = vmatprep.subr.bf16.mxu1 %v909_v0 }
 0x146   :  { %782 = vmatpush3.bf16.msra.mxu1 %v781_v31 }
 0x147   :  { %783 = vmatprep.subr.bf16.mxu1 %v909_v0 }
 0x14a   :  { %785 = vmatpush3.bf16.msra.mxu1 %v784_v34 }
 0x14b   :  { %786 = vmatprep.subr.bf16.mxu1 %v909_v0 }
 0x14e   :  { %788 = vmatpush3.bf16.msra.mxu1 %v787_v40 }
 0x204   :  { %v266_v42 = vpop.f32.mrb[0].mxu1 }
 0x205   :  { %v267_v43 = vadd.f32 %v481_v41, %v266_v42  ;;  %v622_v44 = vpop.f32.mrb[1].mxu1 }
 0x207   :  { %v270_v45 = vmax.f32 %v267_v43, 0.0 }
 0x209   :  { %656 = vmatmul.mubr.f32.vlgmr.msra.gmra.mrb[2].mxu0 %v270_v45  ;;  %691 = vmatmul.mubr.f32.vlgmr.msra.gmra.mrb[2].mxu1 %v270_v45 }
 0x2dc   :  { %v341_v47 = vpop.f32.mrb[2].mxu0  ;;  %v415_v48 = vpop.f32.mrb[2].mxu1 }
 0x2dd   :  { %v416_v49 = vadd.f32 %v483_v46, %v415_v48  ;;  %v657_v0 = vpop.f32.mrb[3].mxu0  ;;  %v692_v50 = vpop.f32.mrb[3].mxu1  ;;  %v342_v57 = vadd.f32 %v482_v54, %v341_v47 }
 0x2df   :  { %v419_v51 = vmax.f32 %v416_v49, -20.0 }
 0x2e1   :  { %v420_v52 = vmin.f32 %v419_v51, 2.0 }
 0x2e3   :  { %v421_v53 = vmul.f32 1.442695, %v420_v52 }
 0x2e5   :  { %798 = vpow2.f32 %v421_v53 }
 0x2ef   :  { %v799_v56 = vpop.eup %798 }
 0x2f0   :  { %v424_v58 = vmul.f32 %v799_v56, %v423_v55  ;;  %800 = vrcp.f32 %v799_v56 }
 0x2f2   :  { %v425_v59 = vadd.f32 %v424_v58, %v342_v57 }
 0x2f4   :  { %v426_v60 = vsub.f32 %v425_v59, %v342_v57  ;;  %v433_v61 = vmul.f32 -2.0, %v425_v59  ;;  %v443_v15 = vsub.f32 0.6931472, %v425_v59  ;;  %v453_v22 = vsub.f32 0.0, %v425_v59 }
 0x2f6   :  { %v435_v62 = vand.u32 2147483647, %v433_v61  ;;  %v434_v12 = vmax.f32 %v433_v61, 0.0  ;;  %v454_v23 = vmul.f32 1.442695, %v453_v22 }
 0x2f8   :  { %v436_v63 = vsub.f32 0.0, %v435_v62 }
 0x2fa   :  { %v801_v2 = vpop.eup %800  ;;  %v437_v3 = vmul.f32 1.442695, %v436_v63 }
 0x2fb   :  { %v428_v4 = vmul.f32 %v801_v2, %v426_v60 }
 0x2fc   :  { %802 = vpow2.f32 %v437_v3 }
 0x2fd   :  { %v429_v5 = vmul.f32 -0.5, %v428_v4 }
 0x2ff   :  { %v430_v6 = vmul.f32 %v429_v5, %v428_v4 }
 0x301   :  { %v431_v7 = vsub.f32 %v430_v6, %v420_v52 }
 0x303   :  { %v484_v18 = vadd.f32 -0.9189385, %v431_v7 }
 0x306   :  { %v803_v8 = vpop.eup %802 }
 0x307   :  { %v439_v9 = vadd.f32 1.0, %v803_v8 }
 0x309   :  { %804 = vlog2.f32 %v439_v9 }
 0x30a   :  { %806 = vpow2.f32 %v454_v23 }
 0x313   :  { %v805_v10 = vpop.eup %804 }
 0x314   :  { %v441_v13 = vmul.f32 0.6931472, %v805_v10  ;;  %v807_v24 = vpop.eup %806 }
 0x315   :  { %v456_v25 = vadd.f32 1.0, %v807_v24 }
 0x316   :  { %v442_v14 = vadd.f32 %v441_v13, %v434_v12 }
 0x317   :  { %808 = vrcp.f32 %v456_v25 }
 0x318   :  { %v444_v17 = vsub.f32 %v443_v15, %v442_v14 }
 0x31a   :  { %v445_v19 = vmul.f32 2.0, %v444_v17 }
 0x31c   :  { %v449_v20 = vsub.f32 %v484_v18, %v445_v19 }
 0x31e   :  { %v450_v21 = vsel %vm448_vm1, %v449_v20, 0.0 }
 0x31f   :  { %451 = vadd.xlane.f32.xlu0 %v450_v21 }
 0x321   :  { %v809_v26 = vpop.eup %808 }
 0x322   :  { %v459_v28 = vmul.f32 1.5, %v809_v26 }
 0x3ac   :  { %v452_v27 = vpop.xlane.xlu0 %451 }
 0x3ad   :  { %v461_v29 = vsel %vm460_vm2, %v452_v27, 0.0 }
 0x3ae   :  { %v462_v1 = vsel %vm448_vm1, %v459_v28, %v461_v29 }
 0x3af   :  { %463 = vst [vmem:[#allocation8] sm:$0xff] %v462_v1 }
 0x3b0   :  { %887 = shalt.err (!%p884_p0)
}
 0x3b1   :  { %s888_s25 = scalar_lea.hbm %s1026_s3, 128 }
 0x3b2   :  { %p889_p1 = scmp.ne.s32.totalorder %s1026_s3, %s888_s25  ;;  %p892_p2 = scmp.lt.u32.totalorder %s888_s25, %s1026_s3 }
 0x3b4   :  { %p894_p3 = pnand %p892_p2, %p889_p1 }
 0x3b6   :  { %897 = shalt.err (!%p894_p3)
}
 0x3b7   :  { %473 = dma.vmem_to_hbm [thread:$0]  %s471_s21, 128, %s1026_s3, [#allocation4]  }
 0x3b8   :  { %902 = dma.done.wait [#allocation4], 128  }
 0x3b9   :  { %903 = vsyncadd [#allocation4], 4294967168 }
 0x3ba   :  { %477 = vsyncpa [#allocation3], 1 }
 0x3bb   :  { %478 = vsyncpa [#allocation6], 1 }
 0x3bc   :  { %479 = vsyncpa [#allocation4], 1 }

</bundles_post_ra>
